<compile_context>
chip_gen: v6e
topology: v6e:2x2x1
jax: 0.10.0
libtpu: 0.0.40
codegen_flags: <defaults>
</compile_context>

<pallas_src>
import jax
import jax.numpy as jnp
from jax.experimental import pallas as pl
from jax.experimental.pallas import tpu as pltpu


# --------------------------------------------------------------------------- #
# Helpers
# --------------------------------------------------------------------------- #
def _round_up(x, m):
    return ((x + m - 1) // m) * m


def _tpu_limits():
    """Return (usable VMEM cap in bytes, preferred K/N alignment for large dims)."""
    vmem_phys = 64 * 1024 * 1024        # conservative default: v7x per-TC VMEM
    align = 128                         # v5e MXU is 128x128
    try:
        info = pltpu.get_tpu_info()
        vmem_phys = int(getattr(info, "vmem_capacity_bytes", vmem_phys))
        name = str(getattr(info, "chip_version", "")).lower()
        if ("v6" in name) or ("v7" in name) or ("trillium" in name):
            align = 256                 # v6e/v7x MXUs are 2x256x256
    except Exception:
        pass
    vmem_cap = int(0.8 * vmem_phys)     # headroom for compiler scratch / spills
    return vmem_cap, align


def _pad_dim(d, align):
    if d <= 128:
        return 128
    return _round_up(d, align)


def _pad_to(a, shape, dtype):
    a = jnp.asarray(a).astype(dtype)
    if a.shape == tuple(shape):
        return a                        # skip the extra HBM pass when aligned
    out = jnp.zeros(shape, dtype)
    return out.at[tuple(slice(0, s) for s in a.shape)].set(a)


def _resident(shape):
    """BlockSpec for a weight that never changes across the grid: constant
    index_map + single buffer (halves resident-weight VMEM vs default)."""
    return pl.BlockSpec(shape, lambda *_: (0,) * len(shape),
                        pipeline_mode=pl.Buffered(1))


def _choose_tile_n(n, per_row_bytes, fixed_bytes, vmem_cap):
    """Largest MXU-M-friendly row tile that fits the VMEM budget."""
    if n <= 128:
        # tiny batches: single lane-dense tile, >=16 rows for bf16 sublane packing
        return max(16, _round_up(n, 16))
    budget = vmem_cap - fixed_bytes - (2 << 20)
    t = budget // max(per_row_bytes, 1)
    t = min(int(t), 1024, _round_up(n, 128))
    t = max(128, (t // 128) * 128)
    # keep >= 2 grid steps where possible so a 2-TC chip (v7x) can shard the
    # "parallel" row axis across both TensorCores
    if _round_up(n, 128) >= 256:
        t = min(t, _round_up((n + 1) // 2, 128))
    return t


# --------------------------------------------------------------------------- #
# Kernels
# --------------------------------------------------------------------------- #
def _fused_kernel(x_ref, w1_ref, b1_ref, w2p_ref, b2p_ref, out_ref):
    # hidden = ReLU(x @ W1 + b1)   (bf16 MXU operands, f32 accumulation)
    h = jnp.dot(x_ref[...], w1_ref[...], preferred_element_type=jnp.float32)
    h = jnp.maximum(h + b1_ref[...], 0.0)
    # logits = hidden @ (W2 @ Wp) + (b2 @ Wp)
    out_ref[...] = (jnp.dot(h.astype(w2p_ref.dtype), w2p_ref[...],
                            preferred_element_type=jnp.float32)
                    + b2p_ref[...]).astype(out_ref.dtype)


def _fused_ksplit_kernel(x_ref, w1_ref, b1_ref, w2p_ref, b2p_ref, out_ref, acc_ref):
    # d_in is split across grid axis 1; W1 tiles stream through VMEM.
    k = pl.program_id(1)

    @pl.when(k == 0)
    def _():
        acc_ref[...] = jnp.zeros_like(acc_ref)

    acc_ref[...] += jnp.dot(x_ref[...], w1_ref[...],
                            preferred_element_type=jnp.float32)

    @pl.when(k == pl.num_programs(1) - 1)
    def _():
        h = jnp.maximum(acc_ref[...] + b1_ref[...], 0.0)
        out_ref[...] = (jnp.dot(h.astype(w2p_ref.dtype), w2p_ref[...],
                                preferred_element_type=jnp.float32)
                        + b2p_ref[...]).astype(out_ref.dtype)


def _unfused_kernel(x_ref, w1_ref, b1_ref, w2_ref, b2_ref, wp_ref, out_ref):
    # 3-matmul form (used when padded num_classes > padded repr_dim, i.e. the
    # algebraic fusion would inflate MXU work).
    h = jnp.dot(x_ref[...], w1_ref[...], preferred_element_type=jnp.float32)
    h = jnp.maximum(h + b1_ref[...], 0.0)
    r = jnp.dot(h.astype(w2_ref.dtype), w2_ref[...],
                preferred_element_type=jnp.float32) + b2_ref[...]
    out_ref[...] = jnp.dot(r.astype(wp_ref.dtype), wp_ref[...],
                           preferred_element_type=jnp.float32).astype(out_ref.dtype)


# --------------------------------------------------------------------------- #
# One-time (parameter-load-time) preparation
# --------------------------------------------------------------------------- #
def prepare_branch_params(w1, b1, w2, b2, wp, *,
                          force_k_split=False, force_unfused=False):
    """Hoisted weight-side work for one branch of AbstractModule:
    optional fusion of the trailing matmuls, MXU/lane-friendly padding and
    bf16 casting.  Call once per branch; the result is reused by every forward.
    """
    d_in, hidden = w1.shape
    repr_dim = w2.shape[1]
    num_classes = wp.shape[1]
    b1 = jnp.asarray(b1).reshape(1, hidden)
    b2 = jnp.asarray(b2).reshape(1, repr_dim)

    vmem_cap, align = _tpu_limits()

    hidden_p = _pad_dim(hidden, align)
    r_p = _pad_dim(repr_dim, align)
    c_p = _pad_dim(num_classes, align)
    d_in_full = _pad_dim(d_in, align)

    # Fuse logits = (h@W2 + b2)@Wp into h@(W2@Wp) + b2@Wp only when it does not
    # inflate MXU work (padded C <= padded repr_dim).
    fused = (not force_unfused) and (c_p <= r_p)

    # Stream W1 over a d_in-reduction grid axis when the resident bf16 W1 would
    # eat more than ~1/3 of the usable VMEM (v7x-relevant fallback).
    k_split = fused and (force_k_split or d_in_full * hidden_p * 2 > vmem_cap // 3)
    if k_split:
        tk = 128
        cap = max(vmem_cap // 3, 4 * 1024 * 1024)
        for cand in (2048, 1024, 512, 256, 128):
            if cand <= d_in_full and 2 * cand * hidden_p * 2 <= cap:
                tk = cand
                break
        d_in_p = _round_up(d_in, tk)
    else:
        tk = d_in_full
        d_in_p = d_in_full

    w1_p = _pad_to(w1, (d_in_p, hidden_p), jnp.bfloat16)
    b1_p = _pad_to(b1, (1, hidden_p), jnp.float32)

    if fused:
        w2p = w2.astype(jnp.float32) @ wp.astype(jnp.float32)   # (hidden, C)
        b2p = b2.astype(jnp.float32) @ wp.astype(jnp.float32)   # (1, C)
        weights = (w1_p, b1_p,
                   _pad_to(w2p, (hidden_p, c_p), jnp.bfloat16),
                   _pad_to(b2p, (1, c_p), jnp.float32))
    else:
        weights = (w1_p, b1_p,
                   _pad_to(w2, (hidden_p, r_p), jnp.bfloat16),
                   _pad_to(b2, (1, r_p), jnp.float32),
                   _pad_to(wp, (r_p, c_p), jnp.bfloat16))

    return dict(d_in=d_in, hidden=hidden, repr_dim=repr_dim,
                num_classes=num_classes,
                d_in_p=d_in_p, hidden_p=hidden_p, r_p=r_p, c_p=c_p,
                fused=fused, k_split=k_split, tk=tk, vmem_cap=vmem_cap,
                weights=weights)


# --------------------------------------------------------------------------- #
# Forward pass for one branch
# --------------------------------------------------------------------------- #
def abstract_module_branch(x, params, *, tile_n=None, out_dtype=jnp.float32):
    """logits = (ReLU(x @ W1 + b1) @ W2 + b2) @ Wp for one prepared branch."""
    n, d_in = x.shape
    assert d_in == params["d_in"]
    d_in_p, hidden_p = params["d_in_p"], params["hidden_p"]
    r_p, c_p = params["r_p"], params["c_p"]
    num_classes = params["num_classes"]
    fused, k_split, tk = params["fused"], params["k_split"], params["tk"]
    vmem_cap = params["vmem_cap"]
    weights = params["weights"]

    # ---- VMEM accounting (resident weights + per-row tile/scratch bytes) ----
    if fused and not k_split:
        fixed = sum(int(w.nbytes) for w in weights)
        per_row = 2 * d_in_p * 2 + 2 * c_p * 4 + hidden_p * 6 + c_p * 4
    elif fused:
        # W1 is streamed (double-buffered (tk, H) tiles); rest is resident.
        fixed = 2 * tk * hidden_p * 2 + sum(int(w.nbytes) for w in weights[1:])
        per_row = 2 * tk * 2 + 2 * c_p * 4 + hidden_p * 4 + hidden_p * 6 + c_p * 4
    else:
        fixed = sum(int(w.nbytes) for w in weights)
        per_row = 2 * d_in_p * 2 + 2 * c_p * 4 + hidden_p * 6 + r_p * 6 + c_p * 4

    if tile_n is None:
        tile_n = _choose_tile_n(n, per_row, fixed, vmem_cap)
    else:
        tile_n = max(16, _round_up(min(tile_n, _round_up(n, 16)), 16))
    n_p = _round_up(n, tile_n)

    x_p = _pad_to(x, (n_p, d_in_p), jnp.bfloat16)

    # ---- grid / specs ---------------------------------------------------- #
    if fused and not k_split:
        grid = (n_p // tile_n,)
        kernel = _fused_kernel
        in_specs = [
            pl.BlockSpec((tile_n, d_in_p), lambda i: (i, 0)),     # x (streamed)
            _resident((d_in_p, hidden_p)),                        # W1
            _resident((1, hidden_p)),                             # b1
            _resident((hidden_p, c_p)),                           # W2 @ Wp
            _resident((1, c_p)),                                  # b2 @ Wp
        ]
        out_specs = pl.BlockSpec((tile_n, c_p), lambda i: (i, 0))
        scratch_shapes = []
        dims = ("parallel",)
    elif fused:
        n_k = d_in_p // tk
        grid = (n_p // tile_n, n_k)
        kernel = _fused_ksplit_kernel
        in_specs = [
            pl.BlockSpec((tile_n, tk), lambda i, k: (i, k)),      # x (streamed)
            pl.BlockSpec((tk, hidden_p), lambda i, k: (k, 0)),    # W1 (streamed)
            _resident((1, hidden_p)),                             # b1
            _resident((hidden_p, c_p)),                           # W2 @ Wp
            _resident((1, c_p)),                                  # b2 @ Wp
        ]
        out_specs = pl.BlockSpec((tile_n, c_p), lambda i, k: (i, 0))
        scratch_shapes = [pltpu.VMEM((tile_n, hidden_p), jnp.float32)]
        dims = ("parallel", "arbitrary")
    else:
        grid = (n_p // tile_n,)
        kernel = _unfused_kernel
        in_specs = [
            pl.BlockSpec((tile_n, d_in_p), lambda i: (i, 0)),     # x (streamed)
            _resident((d_in_p, hidden_p)),                        # W1
            _resident((1, hidden_p)),                             # b1
            _resident((hidden_p, r_p)),                           # W2
            _resident((1, r_p)),                                  # b2
            _resident((r_p, c_p)),                                # Wp
        ]
        out_specs = pl.BlockSpec((tile_n, c_p), lambda i: (i, 0))
        scratch_shapes = []
        dims = ("parallel",)

    if fused:
        flops = 2 * n_p * (d_in_p * hidden_p + hidden_p * c_p)
    else:
        flops = 2 * n_p * (d_in_p * hidden_p + hidden_p * r_p + r_p * c_p)
    out_itemsize = jnp.dtype(out_dtype).itemsize
    bytes_accessed = (int(x_p.nbytes) + sum(int(w.nbytes) for w in weights)
                      + n_p * c_p * out_itemsize)
    cost = pl.CostEstimate(flops=flops, transcendentals=0,
                           bytes_accessed=bytes_accessed)

    needed = fixed + tile_n * per_row
    vmem_limit = int(min(vmem_cap, max(32 * 1024 * 1024, int(1.5 * needed))))

    out_p = pl.pallas_call(
        kernel,
        out_shape=jax.ShapeDtypeStruct((n_p, c_p), out_dtype),
        grid=grid,
        in_specs=in_specs,
        out_specs=out_specs,
        scratch_shapes=scratch_shapes,
        compiler_params=pltpu.CompilerParams(
            dimension_semantics=dims,
            vmem_limit_bytes=vmem_limit,
        ),
        cost_estimate=cost,
    )(x_p, *weights)

    if (n_p, c_p) != (n, num_classes):
        out_p = out_p[:n, :num_classes]
    return out_p


# --------------------------------------------------------------------------- #
# Reference + test
# --------------------------------------------------------------------------- #
def _reference(x, w1, b1, w2, b2, wp):
    h = jnp.maximum(x @ w1 + b1[None, :], 0.0)
    return (h @ w2 + b2[None, :]) @ wp


def _check(out, ref, tol=2e-2):
    err = float(jnp.linalg.norm(out.astype(jnp.float32) - ref)
                / (jnp.linalg.norm(ref) + 1e-6))
    assert err < tol, f"relative error {err} >= {tol}"


if __name__ == "__main__":
    key = jax.random.PRNGKey(0)
    ks = jax.random.split(key, 6)

    def xavier_normal(k, shape, gain):
        fan_in, fan_out = shape
        std = gain * (2.0 / (fan_in + fan_out)) ** 0.5
        return std * jax.random.normal(k, shape, dtype=jnp.float32)

    def make_branch(kx, kw, n, d_in, hidden, repr_dim, num_classes):
        k1, k2, k3, k4, k5 = jax.random.split(kw, 5)
        x = jax.random.normal(kx, (n, d_in), dtype=jnp.float32)
        w1 = xavier_normal(k1, (d_in, hidden), 2.0 ** 0.5)   # repr_mlps[name][0]
        b1 = 0.1 * jax.random.normal(k2, (hidden,), dtype=jnp.float32)
        w2 = xavier_normal(k3, (hidden, repr_dim), 1.0)      # repr_mlps[name][2]
        b2 = 0.1 * jax.random.normal(k4, (repr_dim,), dtype=jnp.float32)
        wp = xavier_normal(k5, (repr_dim, num_classes), 1.0) # linear_predictors[name]
        return x, w1, b1, w2, b2, wp

    # 1) main path: fused 2-matmul kernel, weights fully VMEM-resident.
    x, w1, b1, w2, b2, wp = make_branch(ks[0], ks[1], 8, 32, 64, 32, 16)
    params = prepare_branch_params(w1, b1, w2, b2, wp)
    assert params["fused"] and not params["k_split"]
    out = jax.block_until_ready(abstract_module_branch(x, params))
    assert out.shape == (8, 16)
    _check(out, _reference(x, w1, b1, w2, b2, wp))

    # 2) K-split fallback: large input_dim, W1 streamed over a reduction axis.
    x, w1, b1, w2, b2, wp = make_branch(ks[2], ks[3], 300, 1100, 64, 32, 16)
    params = prepare_branch_params(w1, b1, w2, b2, wp, force_k_split=True)
    assert params["fused"] and params["k_split"]
    out = jax.block_until_ready(abstract_module_branch(x, params))
    assert out.shape == (300, 16)
    _check(out, _reference(x, w1, b1, w2, b2, wp))

    # 3) many-classes branch: fusion guarded off -> 3-matmul kernel.
    x, w1, b1, w2, b2, wp = make_branch(ks[4], ks[5], 8, 32, 64, 32, 200)
    params = prepare_branch_params(w1, b1, w2, b2, wp)
    assert not params["fused"]
    out = jax.block_until_ready(abstract_module_branch(x, params))
    assert out.shape == (8, 200)
    _check(out, _reference(x, w1, b1, w2, b2, wp))

    print("KERNEL_OK")
</pallas_src>

<mosaic_0001>
module attributes {stable_mosaic.version = 11 : i64} {
  func.func @_fused_kernel(%arg0: i32, %arg1: memref<16x128xbf16, #tpu.memory_space<vmem>>, %arg2: memref<128x128xbf16, #tpu.memory_space<vmem>>, %arg3: memref<1x128xf32, #tpu.memory_space<vmem>>, %arg4: memref<128x128xbf16, #tpu.memory_space<vmem>>, %arg5: memref<1x128xf32, #tpu.memory_space<vmem>>, %arg6: memref<16x128xf32, #tpu.memory_space<vmem>>) attributes {dimension_semantics = [#tpu.dimension_semantics<parallel>], iteration_bounds = array<i64: 1>, scalar_prefetch = 0 : i64, scratch_operands = 0 : i64, tpu.core_type = #tpu.core_type<tc>, window_params = [{transform_indices = @transform_0, window_bounds = array<i64: 16, 128>}, {pipeline_mode = #tpu.pipeline_mode<synchronous>, transform_indices = @transform_1, window_bounds = array<i64: 128, 128>}, {pipeline_mode = #tpu.pipeline_mode<synchronous>, transform_indices = @transform_2, window_bounds = array<i64: 1, 128>}, {pipeline_mode = #tpu.pipeline_mode<synchronous>, transform_indices = @transform_3, window_bounds = array<i64: 128, 128>}, {pipeline_mode = #tpu.pipeline_mode<synchronous>, transform_indices = @transform_4, window_bounds = array<i64: 1, 128>}, {transform_indices = @transform_5, window_bounds = array<i64: 16, 128>}]} {
    %c0 = arith.constant 0 : index
    %c0_0 = arith.constant 0 : index
    %0 = vector.load %arg1[%c0, %c0_0] : memref<16x128xbf16, #tpu.memory_space<vmem>>, vector<16x128xbf16>
    %c0_1 = arith.constant 0 : index
    %c0_2 = arith.constant 0 : index
    %1 = vector.load %arg2[%c0_1, %c0_2] : memref<128x128xbf16, #tpu.memory_space<vmem>>, vector<128x128xbf16>
    %cst = arith.constant dense<0.000000e+00> : vector<16x128xf32>
    %2 = tpu.matmul %0, %1, %cst {dimension_numbers = #tpu.dot_dimension_numbers<[1], [0], [0], [1], [0, 0, 1, 1], [], []>} : vector<16x128xbf16>, vector<128x128xbf16>, vector<16x128xf32> -> vector<16x128xf32>
    %c0_3 = arith.constant 0 : index
    %c0_4 = arith.constant 0 : index
    %3 = vector.load %arg3[%c0_3, %c0_4] : memref<1x128xf32, #tpu.memory_space<vmem>>, vector<1x128xf32>
    %4 = vector.broadcast %3 : vector<1x128xf32> to vector<16x128xf32>
    %5 = arith.addf %2, %4 : vector<16x128xf32>
    %cst_5 = arith.constant 0.000000e+00 : f32
    %6 = vector.broadcast %cst_5 : f32 to vector<16x128xf32>
    %7 = arith.maximumf %5, %6 : vector<16x128xf32>
    %8 = arith.truncf %7 : vector<16x128xf32> to vector<16x128xbf16>
    %c0_6 = arith.constant 0 : index
    %c0_7 = arith.constant 0 : index
    %9 = vector.load %arg4[%c0_6, %c0_7] : memref<128x128xbf16, #tpu.memory_space<vmem>>, vector<128x128xbf16>
    %cst_8 = arith.constant dense<0.000000e+00> : vector<16x128xf32>
    %10 = tpu.matmul %8, %9, %cst_8 {dimension_numbers = #tpu.dot_dimension_numbers<[1], [0], [0], [1], [0, 0, 1, 1], [], []>} : vector<16x128xbf16>, vector<128x128xbf16>, vector<16x128xf32> -> vector<16x128xf32>
    %c0_9 = arith.constant 0 : index
    %c0_10 = arith.constant 0 : index
    %11 = vector.load %arg5[%c0_9, %c0_10] : memref<1x128xf32, #tpu.memory_space<vmem>>, vector<1x128xf32>
    %12 = vector.broadcast %11 : vector<1x128xf32> to vector<16x128xf32>
    %13 = arith.addf %10, %12 : vector<16x128xf32>
    %c0_11 = arith.constant 0 : index
    %c0_12 = arith.constant 0 : index
    %14 = vector.load %arg6[%c0_11, %c0_12] : memref<16x128xf32, #tpu.memory_space<vmem>>, vector<16x128xf32>
    tpu.vector_store %arg6[%c0_11, %c0_12], %13 {strides = array<i32>} : memref<16x128xf32, #tpu.memory_space<vmem>>, vector<16x128xf32>,
    return
  }
  func.func @transform_0(%arg0: i32) -> (i32, i32) {
    %c0_i32 = arith.constant 0 : i32
    %c0_i32_0 = arith.constant 0 : i32
    return %arg0, %c0_i32 : i32, i32
  }
  func.func @transform_1(%arg0: i32) -> (i32, i32) {
    %c0_i32 = arith.constant 0 : i32
    %c0_i32_0 = arith.constant 0 : i32
    %c0_i32_1 = arith.constant 0 : i32
    return %c0_i32, %c0_i32_0 : i32, i32
  }
  func.func @transform_2(%arg0: i32) -> (i32, i32) {
    %c0_i32 = arith.constant 0 : i32
    %c0_i32_0 = arith.constant 0 : i32
    %c0_i32_1 = arith.constant 0 : i32
    return %c0_i32, %c0_i32_0 : i32, i32
  }
  func.func @transform_3(%arg0: i32) -> (i32, i32) {
    %c0_i32 = arith.constant 0 : i32
    %c0_i32_0 = arith.constant 0 : i32
    %c0_i32_1 = arith.constant 0 : i32
    return %c0_i32, %c0_i32_0 : i32, i32
  }
  func.func @transform_4(%arg0: i32) -> (i32, i32) {
    %c0_i32 = arith.constant 0 : i32
    %c0_i32_0 = arith.constant 0 : i32
    %c0_i32_1 = arith.constant 0 : i32
    return %c0_i32, %c0_i32_0 : i32, i32
  }
  func.func @transform_5(%arg0: i32) -> (i32, i32) {
    %c0_i32 = arith.constant 0 : i32
    %c0_i32_0 = arith.constant 0 : i32
    return %arg0, %c0_i32 : i32, i32
  }
}

</mosaic_0001>

<bundles_post_ra>
// kernel: tpu_custom_call.1
= control target key start
LH: loop header
LB: loop body
LE: loop exit
PB: predicated region body
PF: predicated region fallthrough
CT: control target
= control target key end

     0   :  { %10 = vsyncpa [#allocation3], 0  ;;  %s566_s0 = inlined_call_operand.hbm [shape: bf16[16,128], index: 0, kind: input, shape index: {}]   ;;  %s567_s1 = inlined_call_operand.hbm [shape: bf16[128,128], index: 1, kind: input, shape index: {}]   ;;  %s568_s2 = inlined_call_operand.vmem [shape: f32[1,128], index: 2, kind: input, shape index: {}]   ;;  %s569_s3 = inlined_call_operand.hbm [shape: bf16[128,128], index: 3, kind: input, shape index: {}]   ;;  %s570_s4 = inlined_call_operand.vmem [shape: f32[1,128], index: 4, kind: input, shape index: {}]   ;;  %s571_s5 = inlined_call_operand.hbm [shape: f32[16,128], index: 5, kind: output, shape index: {}]  }
   0x1   :  { %11 = vsyncpa [#allocation6], 0 }
   0x2   :  { %12 = vsyncpa [#allocation4], 0  ;;  %s508_s18 = smov [#allocation5]   ;;  %s509_s20 = smov [#allocation2]  }
   0x3   :  { %s30_s19 = sshll.u32 %s508_s18, 4  ;;  %s18_s21 = sshll.u32 %s509_s20, 4  ;;  %s31_s19 = int_to_ptr.vmem [resolvable:$true] %s30_s19  ;;  %s19_s21 = int_to_ptr.vmem [resolvable:$true] %s18_s21 }
   0x4   :  { %s430_s22 = scalar_lea.vmem %s31_s19, 1024  ;;  %p435_p1 = scmp.lt.s32.totalorder %s31_s19, %s31_s19 }
   0x5   :  { %p431_p0 = scmp.ne.s32.totalorder %s31_s19, %s430_s22  ;;  %p436_p2 = scmp.lt.s32.totalorder %s430_s22, %s430_s22 }
   0x7   :  { %p437_p3 = por %p436_p2, %p435_p1 }
   0x9   :  { %p438_p4 = pnand %p437_p3, %p431_p0 }
   0xb   :  { %441 = shalt.err (!%p438_p4)
}
   0xc   :  { %s510_s23 = smov 64   ;;  %s511_s24 = smov 4  }
   0xd   :  { %36 = dma.hbm_to_vmem [thread:$0]  %s567_s1, 1024, %s31_s19, [#allocation6], %s510_s23, %s510_s23, %s511_s24  }
   0xe   :  { %s450_s27 = scalar_lea.vmem %s19_s21, 128  ;;  %p455_p6 = scmp.lt.s32.totalorder %s19_s21, %s19_s21 }
   0xf   :  { %p451_p5 = scmp.ne.s32.totalorder %s19_s21, %s450_s27  ;;  %p456_p7 = scmp.lt.s32.totalorder %s450_s27, %s450_s27 }
  0x11   :  { %p457_p8 = por %p456_p7, %p455_p6 }
  0x13   :  { %p458_p9 = pnand %p457_p8, %p451_p5 }
  0x15   :  { %461 = shalt.err (!%p458_p9)
}
  0x16   :  { %24 = dma.hbm_to_vmem [thread:$0]  %s566_s0, 128, %s19_s21, [#allocation3], %s510_s23, %s510_s23, %s511_s24  }
  0x17   :  { %s512_s30 = smov [#allocation7]  }
  0x18   :  { %s44_s6 = sshll.u32 %s512_s30, 4  ;;  %s45_s6 = int_to_ptr.vmem [resolvable:$true] %s44_s6 }
  0x19   :  { %s470_s7 = scalar_lea.vmem %s45_s6, 1024  ;;  %p475_p11 = scmp.lt.s32.totalorder %s45_s6, %s45_s6 }
  0x1a   :  { %p471_p10 = scmp.ne.s32.totalorder %s45_s6, %s470_s7  ;;  %p476_p12 = scmp.lt.s32.totalorder %s470_s7, %s470_s7 }
  0x1c   :  { %p477_p13 = por %p476_p12, %p475_p11 }
  0x1e   :  { %p478_p0 = pnand %p477_p13, %p471_p10 }
  0x20   :  { %481 = shalt.err (!%p478_p0)
}
  0x21   :  { %50 = dma.hbm_to_vmem [thread:$0]  %s569_s3, 1024, %s45_s6, [#allocation6], %s510_s23, %s510_s23, %s511_s24  }
  0x22   :  { %502 = dma.done.wait [#allocation3], 128  }
  0x23   :  { %503 = vsyncadd [#allocation3], 4294967168 }
  0x24   :  { %504 = dma.done.wait [#allocation6], 2048  }
  0x25   :  { %505 = vsyncadd [#allocation6], 4294965248  ;;  %v513_v0 = vmov 0.0   ;;  %vm514_vm0 = vmmov 0   ;;  %v405_v1 = vld [vmem:[#allocation5 + $0x38] sm:$0xff]   ;;  %v406_v2 = vld [vmem:[#allocation5 + $0x30] sm:$0xff]  }
  0x26   :  { %355 = vmatprep.subr.bf16.mxu0 %v513_v0  ;;  %371 = vmatprep.mubr.msk.bf16.mxu0 %vm514_vm0, %v513_v0  ;;  %v407_v3 = vld [vmem:[#allocation5 + $0x28] sm:$0xff]   ;;  %v414_v4 = vld [vmem:[#allocation7 + $0x38] sm:$0xff]   ;;  %v408_v5 = vld [vmem:[#allocation5 + $0x20] sm:$0xff]   ;;  %s515_s11 = smov [#allocation8]  }
  0x27   :  { %375 = vmatprep.subr.bf16.mxu1 %v513_v0  ;;  %391 = vmatprep.mubr.msk.bf16.mxu1 %vm514_vm0, %v513_v0  ;;  %v415_v6 = vld [vmem:[#allocation7 + $0x30] sm:$0xff]   ;;  %v409_v7 = vld [vmem:[#allocation5 + $0x18] sm:$0xff]   ;;  %v416_v8 = vld [vmem:[#allocation7 + $0x28] sm:$0xff]   ;;  %s305_s12 = sshll.u32 %s515_s11, 4  ;;  %s306_s12 = int_to_ptr.vmem [resolvable:$true] %s305_s12 }
  0x28   :  { %356 = vmatpush3.bf16.msra.mxu0 %v405_v1  ;;  %376 = vmatpush3.bf16.msra.mxu1 %v414_v4  ;;  %v410_v9 = vld [vmem:[#allocation5 + $0x10] sm:$0xff]   ;;  %v417_v10 = vld [vmem:[#allocation7 + $0x20] sm:$0xff]   ;;  %v411_v11 = vld [vmem:[#allocation5 + $0x8] sm:$0xff]   ;;  %p487_p2 = scmp.lt.s32.totalorder %s306_s12, %s306_s12 }
  0x29   :  { %357 = vmatprep.subr.bf16.mxu0 %v513_v0  ;;  %377 = vmatprep.subr.bf16.mxu1 %v513_v0  ;;  %v418_v12 = vld [vmem:[#allocation7 + $0x18] sm:$0xff]   ;;  %v412_v13 = vld [vmem:[#allocation5] sm:$0xff]   ;;  %v419_v15 = vld [vmem:[#allocation7 + $0x10] sm:$0xff]  }
  0x2a   :  { %v413_v14 = vld [vmem:[#allocation2] sm:$0xff]   ;;  %v420_v16 = vld [vmem:[#allocation7 + $0x8] sm:$0xff]   ;;  %v421_v17 = vld [vmem:[#allocation7] sm:$0xff]  }
  0x2b   :  { %v318_v18 = vld [vmem:[%s568_s2] ss:$0 sm:$0xff]  ;;  %s482_s2 = scalar_lea.vmem %s306_s12, 256 }
  0x2c   :  { %358 = vmatpush3.bf16.msra.mxu0 %v406_v2  ;;  %378 = vmatpush3.bf16.msra.mxu1 %v415_v6  ;;  %v328_v28 = vld [vmem:[%s570_s4] ss:$0 sm:$0xff]  ;;  %p483_p1 = scmp.ne.s32.totalorder %s306_s12, %s482_s2  ;;  %p488_p3 = scmp.lt.s32.totalorder %s482_s2, %s482_s2 }
  0x2d   :  { %359 = vmatprep.subr.bf16.mxu0 %v513_v0  ;;  %379 = vmatprep.subr.bf16.mxu1 %v513_v0 }
  0x2e   :  { %p489_p4 = por %p488_p3, %p487_p2 }
  0x30   :  { %360 = vmatpush3.bf16.msra.mxu0 %v407_v3  ;;  %380 = vmatpush3.bf16.msra.mxu1 %v416_v8  ;;  %p490_p5 = pnand %p489_p4, %p483_p1 }
  0x31   :  { %361 = vmatprep.subr.bf16.mxu0 %v513_v0  ;;  %381 = vmatprep.subr.bf16.mxu1 %v513_v0 }
  0x34   :  { %362 = vmatpush3.bf16.msra.mxu0 %v408_v5  ;;  %382 = vmatpush3.bf16.msra.mxu1 %v417_v10 }
  0x35   :  { %363 = vmatprep.subr.bf16.mxu0 %v513_v0  ;;  %383 = vmatprep.subr.bf16.mxu1 %v513_v0 }
  0x38   :  { %364 = vmatpush3.bf16.msra.mxu0 %v409_v7  ;;  %384 = vmatpush3.bf16.msra.mxu1 %v418_v12 }
  0x39   :  { %365 = vmatprep.subr.bf16.mxu0 %v513_v0  ;;  %385 = vmatprep.subr.bf16.mxu1 %v513_v0 }
  0x3c   :  { %366 = vmatpush3.bf16.msra.mxu0 %v410_v9  ;;  %386 = vmatpush3.bf16.msra.mxu1 %v419_v15 }
  0x3d   :  { %367 = vmatprep.subr.bf16.mxu0 %v513_v0  ;;  %387 = vmatprep.subr.bf16.mxu1 %v513_v0 }
  0x40   :  { %368 = vmatpush3.bf16.msra.mxu0 %v411_v11  ;;  %388 = vmatpush3.bf16.msra.mxu1 %v420_v16 }
  0x41   :  { %369 = vmatprep.subr.bf16.mxu0 %v513_v0  ;;  %389 = vmatprep.subr.bf16.mxu1 %v513_v0 }
  0x44   :  { %370 = vmatpush3.bf16.msra.mxu0 %v412_v13  ;;  %390 = vmatpush3.bf16.msra.mxu1 %v421_v17 }
  0x47   :  { %372 = vmatmul.mubr.bf16.vlgmr.msra.gmra.mxu0 %v413_v14 }
 0x107   :  { %v176_v19 = vpop.f32.mrf.mxu0 }
 0x108   :  { %v177_v21 = vadd.f32 %v318_v18, %v176_v19 }
 0x109   :  { %v373_v20 = vpop.f32.mrf.mxu0 }
 0x10a   :  { %v183_v25 = vmax.f32 %v177_v21, 0.0 }
 0x10b   :  { %v179_v22 = vpop.f32.mrf.mxu0 }
 0x10c   :  { %v180_v23 = vadd.f32 %v318_v18, %v179_v22 }
 0x10d   :  { %v374_v24 = vpop.f32.mrf.mxu0 }
 0x10e   :  { %v184_v26 = vmax.f32 %v180_v23, 0.0 }
 0x110   :  { %v185_v27 = vpack.c.bf16 %v184_v26, %v183_v25 }
 0x112   :  { %392 = vmatmul.mubr.bf16.vlgmr.msra.gmra.mxu1 %v185_v27 }
 0x1d2   :  { %v291_v29 = vpop.f32.mrf.mxu1 }
 0x1d3   :  { %v292_v30 = vadd.f32 %v328_v28, %v291_v29 }
 0x1d4   :  { %v393_v31 = vpop.f32.mrf.mxu1 }
 0x1d5   :  { %298 = vst [vmem:[#allocation8] sm:$0xff] %v292_v30 }
 0x1d6   :  { %v294_v32 = vpop.f32.mrf.mxu1 }
 0x1d7   :  { %v295_v33 = vadd.f32 %v328_v28, %v294_v32 }
 0x1d8   :  { %v394_v34 = vpop.f32.mrf.mxu1 }
 0x1d9   :  { %299 = vst [vmem:[#allocation8 + $0x8] sm:$0xff] %v295_v33 }
 0x1da   :  { %493 = shalt.err (!%p490_p5)
}
 0x1db   :  { %s516_s13 = smov 128   ;;  %s517_s4 = smov 8  }
 0x1dc   :  { %311 = dma.vmem_to_hbm [thread:$0]  %s306_s12, 256, %s571_s5, [#allocation4], %s516_s13, %s516_s13, %s517_s4  }
 0x1dd   :  { %506 = dma.done.wait [#allocation4], 256  }
 0x1de   :  { %507 = vsyncadd [#allocation4], 4294967040 }
 0x1df   :  { %315 = vsyncpa [#allocation3], 1 }
 0x1e0   :  { %316 = vsyncpa [#allocation6], 1 }
 0x1e1   :  { %317 = vsyncpa [#allocation4], 1 }

</bundles_post_ra>
